<compile_context>
chip_gen: v6e
topology: v6e:2x2x1
jax: 0.10.0
libtpu: 0.0.40
codegen_flags: <defaults>
</compile_context>

<pallas_src>
import jax
import jax.numpy as jnp
from jax import lax
from jax.experimental import pallas as pl
from jax.experimental.pallas import tpu as pltpu

# Small, forward-consistent shapes (module uses 128/784/1000/10/25).
BATCH = 8
N_IN = 256
N_HID = 128
N_OUT = 16
NUM_STEPS = 5
BETA = 0.9
THRESHOLD = 1.0

LANE = 128  # TPU lane width: pad output feature dim to a multiple of this.


def snn_kernel(x_ref, w1_ref, b1_ref, w2_ref, b2_ref, out_ref):
    """Whole forward pass in one kernel invocation (grid = (1,)).

    x_ref:  (B, N_IN)          f32
    w1_ref: (N_IN, N_HID)      f32
    b1_ref: (1, N_HID)         f32
    w2_ref: (N_HID, N_OUT_PAD) f32   (zero-padded columns)
    b2_ref: (1, N_OUT_PAD)     f32   (zero-padded columns)
    out_ref:(T, B, N_OUT_PAD)  f32   spk2 record (padded columns stay 0)
    """
    num_steps = out_ref.shape[0]
    b = x_ref.shape[0]
    n_hid = w1_ref.shape[1]
    n_out_p = out_ref.shape[-1]

    # --- Hoisted fc1: x is time-invariant, so cur1 is identical every step. ---
    cur1 = (
        jnp.dot(x_ref[...], w1_ref[...], preferred_element_type=jnp.float32)
        + b1_ref[...]
    )
    # Hoisted fc2 operands (read once; no per-iteration broadcast).
    w2 = w2_ref[...]
    b2 = b2_ref[...]

    def step(t, carry):
        mem1_prev, mem2_prev = carry

        # Layer 1 Leaky (reset-by-subtraction, computed from previous membrane).
        reset1 = (mem1_prev > THRESHOLD).astype(jnp.float32)
        mem1 = BETA * mem1_prev + cur1 - reset1 * THRESHOLD
        spk1 = (mem1 > THRESHOLD).astype(jnp.float32)

        # Layer 2: fc2 + Leaky.
        cur2 = jnp.dot(spk1, w2, preferred_element_type=jnp.float32) + b2
        reset2 = (mem2_prev > THRESHOLD).astype(jnp.float32)
        mem2 = BETA * mem2_prev + cur2 - reset2 * THRESHOLD
        spk2 = (mem2 > THRESHOLD).astype(jnp.float32)

        # Lane-dense (B, 128-multiple) store; whole output block lives in VMEM,
        # one HBM writeback at kernel end.
        out_ref[t] = spk2
        return mem1, mem2

    mem1_0 = jnp.zeros((b, n_hid), jnp.float32)
    mem2_0 = jnp.zeros((b, n_out_p), jnp.float32)
    lax.fori_loop(0, num_steps, step, (mem1_0, mem2_0), unroll=True)


def snn_forward(x, w1_t, b1, w2_t, b2, *, num_steps=NUM_STEPS):
    """x: (B, N_IN); w1_t: (N_IN, N_HID); b1: (1, N_HID); w2_t: (N_HID, N_OUT); b2: (1, N_OUT).
    Returns spk2_rec: (num_steps, B, N_OUT) f32."""
    B, n_in = x.shape
    n_hid = w1_t.shape[1]
    n_out = w2_t.shape[1]

    # Pad the output feature dim to a lane multiple (zero-filled weights/bias columns
    # produce identically-zero padded outputs, sliced off below).
    n_out_p = ((n_out + LANE - 1) // LANE) * LANE
    pad = n_out_p - n_out
    w2_p = jnp.pad(w2_t, ((0, 0), (0, pad)))
    b2_p = jnp.pad(b2, ((0, 0), (0, pad)))

    grid_spec = pltpu.PrefetchScalarGridSpec(
        num_scalar_prefetch=0,
        grid=(1,),  # single step: time loop runs (unrolled) inside the kernel
        in_specs=[
            pl.BlockSpec((B, n_in), lambda i: (0, 0)),
            pl.BlockSpec((n_in, n_hid), lambda i: (0, 0)),
            pl.BlockSpec((1, n_hid), lambda i: (0, 0)),
            pl.BlockSpec((n_hid, n_out_p), lambda i: (0, 0)),
            pl.BlockSpec((1, n_out_p), lambda i: (0, 0)),
        ],
        out_specs=pl.BlockSpec((num_steps, B, n_out_p), lambda i: (0, 0, 0)),
    )

    spk2_rec_p = pl.pallas_call(
        snn_kernel,
        out_shape=jax.ShapeDtypeStruct((num_steps, B, n_out_p), jnp.float32),
        grid_spec=grid_spec,
        compiler_params=pltpu.CompilerParams(
            # Recurrent state carried inside the kernel; single grid step.
            dimension_semantics=("arbitrary",),
        ),
    )(x, w1_t, b1, w2_p, b2_p)

    return spk2_rec_p[:, :, :n_out]


def snn_forward_ref(x, w1_t, b1, w2_t, b2, *, num_steps=NUM_STEPS):
    """Pure-JAX reference mirroring the PyTorch/snntorch semantics."""
    B = x.shape[0]
    mem1 = jnp.zeros((B, w1_t.shape[1]), jnp.float32)
    mem2 = jnp.zeros((B, w2_t.shape[1]), jnp.float32)
    spk2_rec = []
    for _ in range(num_steps):
        cur1 = x @ w1_t + b1
        reset1 = (mem1 > THRESHOLD).astype(jnp.float32)
        mem1 = BETA * mem1 + cur1 - reset1 * THRESHOLD
        spk1 = (mem1 > THRESHOLD).astype(jnp.float32)
        cur2 = spk1 @ w2_t + b2
        reset2 = (mem2 > THRESHOLD).astype(jnp.float32)
        mem2 = BETA * mem2 + cur2 - reset2 * THRESHOLD
        spk2 = (mem2 > THRESHOLD).astype(jnp.float32)
        spk2_rec.append(spk2)
    return jnp.stack(spk2_rec)


if __name__ == "__main__":
    key = jax.random.PRNGKey(0)
    kx, kw1, kb1, kw2, kb2 = jax.random.split(key, 5)

    # Input (already flattened, matches x.view(batch_size, -1)).
    x = jax.random.uniform(kx, (BATCH, N_IN), jnp.float32)  # pixel-like in [0,1)

    # Deterministic PyTorch-Linear-style init: U(-1/sqrt(fan_in), 1/sqrt(fan_in)).
    bound1 = 1.0 / (N_IN ** 0.5)
    w1 = jax.random.uniform(kw1, (N_HID, N_IN), jnp.float32, -bound1, bound1)
    b1 = jax.random.uniform(kb1, (N_HID,), jnp.float32, -bound1, bound1)
    bound2 = 1.0 / (N_HID ** 0.5)
    w2 = jax.random.uniform(kw2, (N_OUT, N_HID), jnp.float32, -bound2, bound2)
    b2 = jax.random.uniform(kb2, (N_OUT,), jnp.float32, -bound2, bound2)

    # Glue: pre-transpose weights to (in, out), reshape biases to (1, out).
    w1_t = w1.T
    w2_t = w2.T
    b1_2d = b1[None, :]
    b2_2d = b2[None, :]

    # TODO(synk): training-mode loss (snntorch SF.ce_count_loss + poptorch.identity_loss)
    # is not implemented; this kernel reproduces the eval-mode forward (spk2_rec).
    spk2_rec = jax.block_until_ready(snn_forward(x, w1_t, b1_2d, w2_t, b2_2d))
    ref = snn_forward_ref(x, w1_t, b1_2d, w2_t, b2_2d)

    assert spk2_rec.shape == (NUM_STEPS, BATCH, N_OUT)
    assert jnp.allclose(spk2_rec, ref), "Pallas kernel disagrees with JAX reference"
    print("KERNEL_OK")
</pallas_src>

<mosaic_0001>
module attributes {stable_mosaic.version = 11 : i64} {
  func.func @snn_kernel(%arg0: i32, %arg1: memref<8x256xf32, #tpu.memory_space<vmem>>, %arg2: memref<256x128xf32, #tpu.memory_space<vmem>>, %arg3: memref<1x128xf32, #tpu.memory_space<vmem>>, %arg4: memref<128x128xf32, #tpu.memory_space<vmem>>, %arg5: memref<1x128xf32, #tpu.memory_space<vmem>>, %arg6: memref<5x8x128xf32, #tpu.memory_space<vmem>>) attributes {dimension_semantics = [#tpu.dimension_semantics<arbitrary>], iteration_bounds = array<i64: 1>, scalar_prefetch = 0 : i64, scratch_operands = 0 : i64, tpu.core_type = #tpu.core_type<tc>, window_params = [{pipeline_mode = #tpu.pipeline_mode<synchronous>, transform_indices = @transform_0, window_bounds = array<i64: 8, 256>}, {pipeline_mode = #tpu.pipeline_mode<synchronous>, transform_indices = @transform_1, window_bounds = array<i64: 256, 128>}, {pipeline_mode = #tpu.pipeline_mode<synchronous>, transform_indices = @transform_2, window_bounds = array<i64: 1, 128>}, {pipeline_mode = #tpu.pipeline_mode<synchronous>, transform_indices = @transform_3, window_bounds = array<i64: 128, 128>}, {pipeline_mode = #tpu.pipeline_mode<synchronous>, transform_indices = @transform_4, window_bounds = array<i64: 1, 128>}, {pipeline_mode = #tpu.pipeline_mode<synchronous>, transform_indices = @transform_5, window_bounds = array<i64: 5, 8, 128>}]} {
    %c0 = arith.constant 0 : index
    %c0_0 = arith.constant 0 : index
    %0 = vector.load %arg1[%c0, %c0_0] : memref<8x256xf32, #tpu.memory_space<vmem>>, vector<8x256xf32>
    %c0_1 = arith.constant 0 : index
    %c0_2 = arith.constant 0 : index
    %1 = vector.load %arg2[%c0_1, %c0_2] : memref<256x128xf32, #tpu.memory_space<vmem>>, vector<256x128xf32>
    %cst = arith.constant dense<0.000000e+00> : vector<8x128xf32>
    %2 = tpu.matmul %0, %1, %cst {dimension_numbers = #tpu.dot_dimension_numbers<[1], [0], [0], [1], [0, 0, 1, 1], [], []>} : vector<8x256xf32>, vector<256x128xf32>, vector<8x128xf32> -> vector<8x128xf32>
    %c0_3 = arith.constant 0 : index
    %c0_4 = arith.constant 0 : index
    %3 = vector.load %arg3[%c0_3, %c0_4] : memref<1x128xf32, #tpu.memory_space<vmem>>, vector<1x128xf32>
    %4 = vector.broadcast %3 : vector<1x128xf32> to vector<8x128xf32>
    %5 = arith.addf %2, %4 : vector<8x128xf32>
    %c0_5 = arith.constant 0 : index
    %c0_6 = arith.constant 0 : index
    %6 = vector.load %arg4[%c0_5, %c0_6] : memref<128x128xf32, #tpu.memory_space<vmem>>, vector<128x128xf32>
    %c0_7 = arith.constant 0 : index
    %c0_8 = arith.constant 0 : index
    %7 = vector.load %arg5[%c0_7, %c0_8] : memref<1x128xf32, #tpu.memory_space<vmem>>, vector<1x128xf32>
    %cst_9 = arith.constant 0.000000e+00 : f32
    %8 = vector.broadcast %cst_9 : f32 to vector<8x128xf32>
    %cst_10 = arith.constant 0.000000e+00 : f32
    %9 = vector.broadcast %cst_10 : f32 to vector<8x128xf32>
    %c0_i32 = arith.constant 0 : i32
    %cst_11 = arith.constant 1.000000e+00 : f32
    %10 = vector.broadcast %cst_11 : f32 to vector<8x128xf32>
    %11 = arith.cmpf ogt, %8, %10 : vector<8x128xf32>
    %12 = arith.extui %11 : vector<8x128xi1> to vector<8x128xi32>
    %13 = arith.sitofp %12 : vector<8x128xi32> to vector<8x128xf32>
    %cst_12 = arith.constant 0.899999976 : f32
    %14 = vector.broadcast %cst_12 : f32 to vector<8x128xf32>
    %15 = arith.mulf %14, %8 : vector<8x128xf32>
    %16 = arith.addf %15, %5 : vector<8x128xf32>
    %cst_13 = arith.constant 1.000000e+00 : f32
    %17 = vector.broadcast %cst_13 : f32 to vector<8x128xf32>
    %18 = arith.mulf %13, %17 : vector<8x128xf32>
    %19 = arith.subf %16, %18 : vector<8x128xf32>
    %cst_14 = arith.constant 1.000000e+00 : f32
    %20 = vector.broadcast %cst_14 : f32 to vector<8x128xf32>
    %21 = arith.cmpf ogt, %19, %20 : vector<8x128xf32>
    %22 = arith.extui %21 : vector<8x128xi1> to vector<8x128xi32>
    %23 = arith.sitofp %22 : vector<8x128xi32> to vector<8x128xf32>
    %cst_15 = arith.constant dense<0.000000e+00> : vector<8x128xf32>
    %24 = tpu.matmul %23, %6, %cst_15 {dimension_numbers = #tpu.dot_dimension_numbers<[1], [0], [0], [1], [0, 0, 1, 1], [], []>} : vector<8x128xf32>, vector<128x128xf32>, vector<8x128xf32> -> vector<8x128xf32>
    %25 = vector.broadcast %7 : vector<1x128xf32> to vector<8x128xf32>
    %26 = arith.addf %24, %25 : vector<8x128xf32>
    %cst_16 = arith.constant 1.000000e+00 : f32
    %27 = vector.broadcast %cst_16 : f32 to vector<8x128xf32>
    %28 = arith.cmpf ogt, %9, %27 : vector<8x128xf32>
    %29 = arith.extui %28 : vector<8x128xi1> to vector<8x128xi32>
    %30 = arith.sitofp %29 : vector<8x128xi32> to vector<8x128xf32>
    %cst_17 = arith.constant 0.899999976 : f32
    %31 = vector.broadcast %cst_17 : f32 to vector<8x128xf32>
    %32 = arith.mulf %31, %9 : vector<8x128xf32>
    %33 = arith.addf %32, %26 : vector<8x128xf32>
    %cst_18 = arith.constant 1.000000e+00 : f32
    %34 = vector.broadcast %cst_18 : f32 to vector<8x128xf32>
    %35 = arith.mulf %30, %34 : vector<8x128xf32>
    %36 = arith.subf %33, %35 : vector<8x128xf32>
    %cst_19 = arith.constant 1.000000e+00 : f32
    %37 = vector.broadcast %cst_19 : f32 to vector<8x128xf32>
    %38 = arith.cmpf ogt, %36, %37 : vector<8x128xf32>
    %39 = arith.extui %38 : vector<8x128xi1> to vector<8x128xi32>
    %40 = arith.sitofp %39 : vector<8x128xi32> to vector<8x128xf32>
    %41 = arith.index_cast %c0_i32 : i32 to index
    %c0_20 = arith.constant 0 : index
    %c0_21 = arith.constant 0 : index
    %42 = vector.load %arg6[%41, %c0_20, %c0_21] : memref<5x8x128xf32, #tpu.memory_space<vmem>>, vector<1x8x128xf32>
    %43 = vector.shape_cast %42 : vector<1x8x128xf32> to vector<8x128xf32>
    %44 = vector.shape_cast %40 : vector<8x128xf32> to vector<1x8x128xf32>
    tpu.vector_store %arg6[%41, %c0_20, %c0_21], %44 {strides = array<i32>} : memref<5x8x128xf32, #tpu.memory_space<vmem>>, vector<1x8x128xf32>,
    %c1_i32 = arith.constant 1 : i32
    %cst_22 = arith.constant 1.000000e+00 : f32
    %45 = vector.broadcast %cst_22 : f32 to vector<8x128xf32>
    %46 = arith.cmpf ogt, %19, %45 : vector<8x128xf32>
    %47 = arith.extui %46 : vector<8x128xi1> to vector<8x128xi32>
    %48 = arith.sitofp %47 : vector<8x128xi32> to vector<8x128xf32>
    %cst_23 = arith.constant 0.899999976 : f32
    %49 = vector.broadcast %cst_23 : f32 to vector<8x128xf32>
    %50 = arith.mulf %49, %19 : vector<8x128xf32>
    %51 = arith.addf %50, %5 : vector<8x128xf32>
    %cst_24 = arith.constant 1.000000e+00 : f32
    %52 = vector.broadcast %cst_24 : f32 to vector<8x128xf32>
    %53 = arith.mulf %48, %52 : vector<8x128xf32>
    %54 = arith.subf %51, %53 : vector<8x128xf32>
    %cst_25 = arith.constant 1.000000e+00 : f32
    %55 = vector.broadcast %cst_25 : f32 to vector<8x128xf32>
    %56 = arith.cmpf ogt, %54, %55 : vector<8x128xf32>
    %57 = arith.extui %56 : vector<8x128xi1> to vector<8x128xi32>
    %58 = arith.sitofp %57 : vector<8x128xi32> to vector<8x128xf32>
    %cst_26 = arith.constant dense<0.000000e+00> : vector<8x128xf32>
    %59 = tpu.matmul %58, %6, %cst_26 {dimension_numbers = #tpu.dot_dimension_numbers<[1], [0], [0], [1], [0, 0, 1, 1], [], []>} : vector<8x128xf32>, vector<128x128xf32>, vector<8x128xf32> -> vector<8x128xf32>
    %60 = vector.broadcast %7 : vector<1x128xf32> to vector<8x128xf32>
    %61 = arith.addf %59, %60 : vector<8x128xf32>
    %cst_27 = arith.constant 1.000000e+00 : f32
    %62 = vector.broadcast %cst_27 : f32 to vector<8x128xf32>
    %63 = arith.cmpf ogt, %36, %62 : vector<8x128xf32>
    %64 = arith.extui %63 : vector<8x128xi1> to vector<8x128xi32>
    %65 = arith.sitofp %64 : vector<8x128xi32> to vector<8x128xf32>
    %cst_28 = arith.constant 0.899999976 : f32
    %66 = vector.broadcast %cst_28 : f32 to vector<8x128xf32>
    %67 = arith.mulf %66, %36 : vector<8x128xf32>
    %68 = arith.addf %67, %61 : vector<8x128xf32>
    %cst_29 = arith.constant 1.000000e+00 : f32
    %69 = vector.broadcast %cst_29 : f32 to vector<8x128xf32>
    %70 = arith.mulf %65, %69 : vector<8x128xf32>
    %71 = arith.subf %68, %70 : vector<8x128xf32>
    %cst_30 = arith.constant 1.000000e+00 : f32
    %72 = vector.broadcast %cst_30 : f32 to vector<8x128xf32>
    %73 = arith.cmpf ogt, %71, %72 : vector<8x128xf32>
    %74 = arith.extui %73 : vector<8x128xi1> to vector<8x128xi32>
    %75 = arith.sitofp %74 : vector<8x128xi32> to vector<8x128xf32>
    %76 = arith.index_cast %c1_i32 : i32 to index
    %c0_31 = arith.constant 0 : index
    %c0_32 = arith.constant 0 : index
    %77 = vector.load %arg6[%76, %c0_31, %c0_32] : memref<5x8x128xf32, #tpu.memory_space<vmem>>, vector<1x8x128xf32>
    %78 = vector.shape_cast %77 : vector<1x8x128xf32> to vector<8x128xf32>
    %79 = vector.shape_cast %75 : vector<8x128xf32> to vector<1x8x128xf32>
    tpu.vector_store %arg6[%76, %c0_31, %c0_32], %79 {strides = array<i32>} : memref<5x8x128xf32, #tpu.memory_space<vmem>>, vector<1x8x128xf32>,
    %c2_i32 = arith.constant 2 : i32
    %cst_33 = arith.constant 1.000000e+00 : f32
    %80 = vector.broadcast %cst_33 : f32 to vector<8x128xf32>
    %81 = arith.cmpf ogt, %54, %80 : vector<8x128xf32>
    %82 = arith.extui %81 : vector<8x128xi1> to vector<8x128xi32>
    %83 = arith.sitofp %82 : vector<8x128xi32> to vector<8x128xf32>
    %cst_34 = arith.constant 0.899999976 : f32
    %84 = vector.broadcast %cst_34 : f32 to vector<8x128xf32>
    %85 = arith.mulf %84, %54 : vector<8x128xf32>
    %86 = arith.addf %85, %5 : vector<8x128xf32>
    %cst_35 = arith.constant 1.000000e+00 : f32
    %87 = vector.broadcast %cst_35 : f32 to vector<8x128xf32>
    %88 = arith.mulf %83, %87 : vector<8x128xf32>
    %89 = arith.subf %86, %88 : vector<8x128xf32>
    %cst_36 = arith.constant 1.000000e+00 : f32
    %90 = vector.broadcast %cst_36 : f32 to vector<8x128xf32>
    %91 = arith.cmpf ogt, %89, %90 : vector<8x128xf32>
    %92 = arith.extui %91 : vector<8x128xi1> to vector<8x128xi32>
    %93 = arith.sitofp %92 : vector<8x128xi32> to vector<8x128xf32>
    %cst_37 = arith.constant dense<0.000000e+00> : vector<8x128xf32>
    %94 = tpu.matmul %93, %6, %cst_37 {dimension_numbers = #tpu.dot_dimension_numbers<[1], [0], [0], [1], [0, 0, 1, 1], [], []>} : vector<8x128xf32>, vector<128x128xf32>, vector<8x128xf32> -> vector<8x128xf32>
    %95 = vector.broadcast %7 : vector<1x128xf32> to vector<8x128xf32>
    %96 = arith.addf %94, %95 : vector<8x128xf32>
    %cst_38 = arith.constant 1.000000e+00 : f32
    %97 = vector.broadcast %cst_38 : f32 to vector<8x128xf32>
    %98 = arith.cmpf ogt, %71, %97 : vector<8x128xf32>
    %99 = arith.extui %98 : vector<8x128xi1> to vector<8x128xi32>
    %100 = arith.sitofp %99 : vector<8x128xi32> to vector<8x128xf32>
    %cst_39 = arith.constant 0.899999976 : f32
    %101 = vector.broadcast %cst_39 : f32 to vector<8x128xf32>
    %102 = arith.mulf %101, %71 : vector<8x128xf32>
    %103 = arith.addf %102, %96 : vector<8x128xf32>
    %cst_40 = arith.constant 1.000000e+00 : f32
    %104 = vector.broadcast %cst_40 : f32 to vector<8x128xf32>
    %105 = arith.mulf %100, %104 : vector<8x128xf32>
    %106 = arith.subf %103, %105 : vector<8x128xf32>
    %cst_41 = arith.constant 1.000000e+00 : f32
    %107 = vector.broadcast %cst_41 : f32 to vector<8x128xf32>
    %108 = arith.cmpf ogt, %106, %107 : vector<8x128xf32>
    %109 = arith.extui %108 : vector<8x128xi1> to vector<8x128xi32>
    %110 = arith.sitofp %109 : vector<8x128xi32> to vector<8x128xf32>
    %111 = arith.index_cast %c2_i32 : i32 to index
    %c0_42 = arith.constant 0 : index
    %c0_43 = arith.constant 0 : index
    %112 = vector.load %arg6[%111, %c0_42, %c0_43] : memref<5x8x128xf32, #tpu.memory_space<vmem>>, vector<1x8x128xf32>
    %113 = vector.shape_cast %112 : vector<1x8x128xf32> to vector<8x128xf32>
    %114 = vector.shape_cast %110 : vector<8x128xf32> to vector<1x8x128xf32>
    tpu.vector_store %arg6[%111, %c0_42, %c0_43], %114 {strides = array<i32>} : memref<5x8x128xf32, #tpu.memory_space<vmem>>, vector<1x8x128xf32>,
    %c3_i32 = arith.constant 3 : i32
    %cst_44 = arith.constant 1.000000e+00 : f32
    %115 = vector.broadcast %cst_44 : f32 to vector<8x128xf32>
    %116 = arith.cmpf ogt, %89, %115 : vector<8x128xf32>
    %117 = arith.extui %116 : vector<8x128xi1> to vector<8x128xi32>
    %118 = arith.sitofp %117 : vector<8x128xi32> to vector<8x128xf32>
    %cst_45 = arith.constant 0.899999976 : f32
    %119 = vector.broadcast %cst_45 : f32 to vector<8x128xf32>
    %120 = arith.mulf %119, %89 : vector<8x128xf32>
    %121 = arith.addf %120, %5 : vector<8x128xf32>
    %cst_46 = arith.constant 1.000000e+00 : f32
    %122 = vector.broadcast %cst_46 : f32 to vector<8x128xf32>
    %123 = arith.mulf %118, %122 : vector<8x128xf32>
    %124 = arith.subf %121, %123 : vector<8x128xf32>
    %cst_47 = arith.constant 1.000000e+00 : f32
    %125 = vector.broadcast %cst_47 : f32 to vector<8x128xf32>
    %126 = arith.cmpf ogt, %124, %125 : vector<8x128xf32>
    %127 = arith.extui %126 : vector<8x128xi1> to vector<8x128xi32>
    %128 = arith.sitofp %127 : vector<8x128xi32> to vector<8x128xf32>
    %cst_48 = arith.constant dense<0.000000e+00> : vector<8x128xf32>
    %129 = tpu.matmul %128, %6, %cst_48 {dimension_numbers = #tpu.dot_dimension_numbers<[1], [0], [0], [1], [0, 0, 1, 1], [], []>} : vector<8x128xf32>, vector<128x128xf32>, vector<8x128xf32> -> vector<8x128xf32>
    %130 = vector.broadcast %7 : vector<1x128xf32> to vector<8x128xf32>
    %131 = arith.addf %129, %130 : vector<8x128xf32>
    %cst_49 = arith.constant 1.000000e+00 : f32
    %132 = vector.broadcast %cst_49 : f32 to vector<8x128xf32>
    %133 = arith.cmpf ogt, %106, %132 : vector<8x128xf32>
    %134 = arith.extui %133 : vector<8x128xi1> to vector<8x128xi32>
    %135 = arith.sitofp %134 : vector<8x128xi32> to vector<8x128xf32>
    %cst_50 = arith.constant 0.899999976 : f32
    %136 = vector.broadcast %cst_50 : f32 to vector<8x128xf32>
    %137 = arith.mulf %136, %106 : vector<8x128xf32>
    %138 = arith.addf %137, %131 : vector<8x128xf32>
    %cst_51 = arith.constant 1.000000e+00 : f32
    %139 = vector.broadcast %cst_51 : f32 to vector<8x128xf32>
    %140 = arith.mulf %135, %139 : vector<8x128xf32>
    %141 = arith.subf %138, %140 : vector<8x128xf32>
    %cst_52 = arith.constant 1.000000e+00 : f32
    %142 = vector.broadcast %cst_52 : f32 to vector<8x128xf32>
    %143 = arith.cmpf ogt, %141, %142 : vector<8x128xf32>
    %144 = arith.extui %143 : vector<8x128xi1> to vector<8x128xi32>
    %145 = arith.sitofp %144 : vector<8x128xi32> to vector<8x128xf32>
    %146 = arith.index_cast %c3_i32 : i32 to index
    %c0_53 = arith.constant 0 : index
    %c0_54 = arith.constant 0 : index
    %147 = vector.load %arg6[%146, %c0_53, %c0_54] : memref<5x8x128xf32, #tpu.memory_space<vmem>>, vector<1x8x128xf32>
    %148 = vector.shape_cast %147 : vector<1x8x128xf32> to vector<8x128xf32>
    %149 = vector.shape_cast %145 : vector<8x128xf32> to vector<1x8x128xf32>
    tpu.vector_store %arg6[%146, %c0_53, %c0_54], %149 {strides = array<i32>} : memref<5x8x128xf32, #tpu.memory_space<vmem>>, vector<1x8x128xf32>,
    %c4_i32 = arith.constant 4 : i32
    %cst_55 = arith.constant 1.000000e+00 : f32
    %150 = vector.broadcast %cst_55 : f32 to vector<8x128xf32>
    %151 = arith.cmpf ogt, %124, %150 : vector<8x128xf32>
    %152 = arith.extui %151 : vector<8x128xi1> to vector<8x128xi32>
    %153 = arith.sitofp %152 : vector<8x128xi32> to vector<8x128xf32>
    %cst_56 = arith.constant 0.899999976 : f32
    %154 = vector.broadcast %cst_56 : f32 to vector<8x128xf32>
    %155 = arith.mulf %154, %124 : vector<8x128xf32>
    %156 = arith.addf %155, %5 : vector<8x128xf32>
    %cst_57 = arith.constant 1.000000e+00 : f32
    %157 = vector.broadcast %cst_57 : f32 to vector<8x128xf32>
    %158 = arith.mulf %153, %157 : vector<8x128xf32>
    %159 = arith.subf %156, %158 : vector<8x128xf32>
    %cst_58 = arith.constant 1.000000e+00 : f32
    %160 = vector.broadcast %cst_58 : f32 to vector<8x128xf32>
    %161 = arith.cmpf ogt, %159, %160 : vector<8x128xf32>
    %162 = arith.extui %161 : vector<8x128xi1> to vector<8x128xi32>
    %163 = arith.sitofp %162 : vector<8x128xi32> to vector<8x128xf32>
    %cst_59 = arith.constant dense<0.000000e+00> : vector<8x128xf32>
    %164 = tpu.matmul %163, %6, %cst_59 {dimension_numbers = #tpu.dot_dimension_numbers<[1], [0], [0], [1], [0, 0, 1, 1], [], []>} : vector<8x128xf32>, vector<128x128xf32>, vector<8x128xf32> -> vector<8x128xf32>
    %165 = vector.broadcast %7 : vector<1x128xf32> to vector<8x128xf32>
    %166 = arith.addf %164, %165 : vector<8x128xf32>
    %cst_60 = arith.constant 1.000000e+00 : f32
    %167 = vector.broadcast %cst_60 : f32 to vector<8x128xf32>
    %168 = arith.cmpf ogt, %141, %167 : vector<8x128xf32>
    %169 = arith.extui %168 : vector<8x128xi1> to vector<8x128xi32>
    %170 = arith.sitofp %169 : vector<8x128xi32> to vector<8x128xf32>
    %cst_61 = arith.constant 0.899999976 : f32
    %171 = vector.broadcast %cst_61 : f32 to vector<8x128xf32>
    %172 = arith.mulf %171, %141 : vector<8x128xf32>
    %173 = arith.addf %172, %166 : vector<8x128xf32>
    %cst_62 = arith.constant 1.000000e+00 : f32
    %174 = vector.broadcast %cst_62 : f32 to vector<8x128xf32>
    %175 = arith.mulf %170, %174 : vector<8x128xf32>
    %176 = arith.subf %173, %175 : vector<8x128xf32>
    %cst_63 = arith.constant 1.000000e+00 : f32
    %177 = vector.broadcast %cst_63 : f32 to vector<8x128xf32>
    %178 = arith.cmpf ogt, %176, %177 : vector<8x128xf32>
    %179 = arith.extui %178 : vector<8x128xi1> to vector<8x128xi32>
    %180 = arith.sitofp %179 : vector<8x128xi32> to vector<8x128xf32>
    %181 = arith.index_cast %c4_i32 : i32 to index
    %c0_64 = arith.constant 0 : index
    %c0_65 = arith.constant 0 : index
    %182 = vector.load %arg6[%181, %c0_64, %c0_65] : memref<5x8x128xf32, #tpu.memory_space<vmem>>, vector<1x8x128xf32>
    %183 = vector.shape_cast %182 : vector<1x8x128xf32> to vector<8x128xf32>
    %184 = vector.shape_cast %180 : vector<8x128xf32> to vector<1x8x128xf32>
    tpu.vector_store %arg6[%181, %c0_64, %c0_65], %184 {strides = array<i32>} : memref<5x8x128xf32, #tpu.memory_space<vmem>>, vector<1x8x128xf32>,
    %c5_i32 = arith.constant 5 : i32
    return
  }
  func.func @transform_0(%arg0: i32) -> (i32, i32) {
    %c0_i32 = arith.constant 0 : i32
    %c0_i32_0 = arith.constant 0 : i32
    %c0_i32_1 = arith.constant 0 : i32
    return %c0_i32, %c0_i32_0 : i32, i32
  }
  func.func @transform_1(%arg0: i32) -> (i32, i32) {
    %c0_i32 = arith.constant 0 : i32
    %c0_i32_0 = arith.constant 0 : i32
    %c0_i32_1 = arith.constant 0 : i32
    return %c0_i32, %c0_i32_0 : i32, i32
  }
  func.func @transform_2(%arg0: i32) -> (i32, i32) {
    %c0_i32 = arith.constant 0 : i32
    %c0_i32_0 = arith.constant 0 : i32
    %c0_i32_1 = arith.constant 0 : i32
    return %c0_i32, %c0_i32_0 : i32, i32
  }
  func.func @transform_3(%arg0: i32) -> (i32, i32) {
    %c0_i32 = arith.constant 0 : i32
    %c0_i32_0 = arith.constant 0 : i32
    %c0_i32_1 = arith.constant 0 : i32
    return %c0_i32, %c0_i32_0 : i32, i32
  }
  func.func @transform_4(%arg0: i32) -> (i32, i32) {
    %c0_i32 = arith.constant 0 : i32
    %c0_i32_0 = arith.constant 0 : i32
    %c0_i32_1 = arith.constant 0 : i32
    return %c0_i32, %c0_i32_0 : i32, i32
  }
  func.func @transform_5(%arg0: i32) -> (i32, i32, i32) {
    %c0_i32 = arith.constant 0 : i32
    %c0_i32_0 = arith.constant 0 : i32
    %c0_i32_1 = arith.constant 0 : i32
    %c0_i32_2 = arith.constant 0 : i32
    return %c0_i32, %c0_i32_0, %c0_i32_1 : i32, i32, i32
  }
}

</mosaic_0001>

<bundles_post_ra>
// kernel: tpu_custom_call.1
= control target key start
LH: loop header
LB: loop body
LE: loop exit
PB: predicated region body
PF: predicated region fallthrough
CT: control target
= control target key end

     0   :  { %10 = vsyncpa [#allocation3], 0  ;;  %s1333_s0 = inlined_call_operand.hbm [shape: f32[8,256], index: 0, kind: input, shape index: {}]   ;;  %s1334_s1 = inlined_call_operand.hbm [shape: f32[256,128], index: 1, kind: input, shape index: {}]   ;;  %s1335_s2 = inlined_call_operand.vmem [shape: f32[1,128], index: 2, kind: input, shape index: {}]   ;;  %s1336_s3 = inlined_call_operand.hbm [shape: f32[128,128], index: 3, kind: input, shape index: {}]   ;;  %s1337_s4 = inlined_call_operand.vmem [shape: f32[1,128], index: 4, kind: input, shape index: {}]   ;;  %s1338_s5 = inlined_call_operand.hbm [shape: f32[5,8,128], index: 5, kind: output, shape index: {}]  }
   0x1   :  { %11 = vsyncpa [#allocation6], 0 }
   0x2   :  { %12 = vsyncpa [#allocation4], 0  ;;  %s1039_s18 = smov [#allocation5]  }
   0x3   :  { %s28_s19 = sshll.u32 %s1039_s18, 4  ;;  %s29_s19 = int_to_ptr.vmem [resolvable:$true] %s28_s19 }
   0x4   :  { %s961_s20 = scalar_lea.vmem %s29_s19, 4096  ;;  %p966_p1 = scmp.lt.s32.totalorder %s29_s19, %s29_s19 }
   0x5   :  { %p962_p0 = scmp.ne.s32.totalorder %s29_s19, %s961_s20  ;;  %p967_p2 = scmp.lt.s32.totalorder %s961_s20, %s961_s20 }
   0x7   :  { %p968_p3 = por %p967_p2, %p966_p1 }
   0x9   :  { %p969_p4 = pnand %p968_p3, %p962_p0 }
   0xb   :  { %972 = shalt.err (!%p969_p4)
}
   0xc   :  { %s1040_s21 = smov 128   ;;  %s1041_s22 = smov 8  }
   0xd   :  { %34 = dma.hbm_to_vmem [thread:$0]  %s1334_s1, 4096, %s29_s19, [#allocation6], %s1040_s21, %s1040_s21, %s1041_s22  }
   0xe   :  { %s1042_s25 = smov [#allocation2]   ;;  %s1043_s27 = smov [#allocation7]  }
   0xf   :  { %s19_s26 = sshll.u32 %s1042_s25, 4  ;;  %s42_s28 = sshll.u32 %s1043_s27, 4  ;;  %s20_s26 = int_to_ptr.vmem [resolvable:$true] %s19_s26  ;;  %s43_s28 = int_to_ptr.vmem [resolvable:$true] %s42_s28 }
  0x10   :  { %s981_s29 = scalar_lea.vmem %s20_s26, 256  ;;  %p986_p6 = scmp.lt.s32.totalorder %s20_s26, %s20_s26 }
  0x11   :  { %p982_p5 = scmp.ne.s32.totalorder %s20_s26, %s981_s29  ;;  %p987_p7 = scmp.lt.s32.totalorder %s981_s29, %s981_s29 }
  0x13   :  { %p988_p8 = por %p987_p7, %p986_p6 }
  0x15   :  { %p989_p9 = pnand %p988_p8, %p982_p5 }
  0x17   :  { %992 = shalt.err (!%p989_p9)
}
  0x18   :  { %22 = dma.hbm_to_vmem [thread:$0]  %s1333_s0, 256, %s20_s26, [#allocation3]  }
  0x19   :  { %s1001_s7 = scalar_lea.vmem %s43_s28, 2048  ;;  %p1006_p11 = scmp.lt.s32.totalorder %s43_s28, %s43_s28 }
  0x1a   :  { %p1002_p10 = scmp.ne.s32.totalorder %s43_s28, %s1001_s7  ;;  %p1007_p12 = scmp.lt.s32.totalorder %s1001_s7, %s1001_s7 }
  0x1c   :  { %p1008_p13 = por %p1007_p12, %p1006_p11 }
  0x1e   :  { %p1009_p0 = pnand %p1008_p13, %p1002_p10 }
  0x20   :  { %1012 = shalt.err (!%p1009_p0)
}
  0x21   :  { %48 = dma.hbm_to_vmem [thread:$0]  %s1336_s3, 2048, %s43_s28, [#allocation6], %s1040_s21, %s1040_s21, %s1041_s22  }
  0x22   :  { %1033 = dma.done.wait [#allocation3], 256  }
  0x23   :  { %1034 = vsyncadd [#allocation3], 4294967040 }
  0x24   :  { %1035 = dma.done.wait [#allocation6], 6144  }
  0x25   :  { %1036 = vsyncadd [#allocation6], 4294961152  ;;  %v1044_v0 = vmov 0.0   ;;  %v93_v1 = vld [vmem:[#allocation5 + $0xf8] sm:$0xff]  ;;  %v92_v3 = vld [vmem:[#allocation5 + $0xf0] sm:$0xff]  ;;  %vm1045_vm0 = vmmov 0  }
  0x26   :  { %769 = vmatprep.subr.mxu1 %v1044_v0  ;;  %v77_v2 = vld [vmem:[#allocation5 + $0x78] sm:$0xff]  ;;  %649 = vmatprep.subr.mxu0 %v93_v1  ;;  %v76_v4 = vld [vmem:[#allocation5 + $0x70] sm:$0xff]  ;;  %v91_v5 = vld [vmem:[#allocation5 + $0xe8] sm:$0xff]  ;;  %v1046_v57 = vmov 1.0  }
  0x27   :  { %650 = vmatpush3.msra.mxu0 %v77_v2  ;;  %v75_v6 = vld [vmem:[#allocation5 + $0x68] sm:$0xff]  ;;  %v90_v7 = vld [vmem:[#allocation5 + $0xe0] sm:$0xff]  ;;  %v89_v9 = vld [vmem:[#allocation5 + $0xd8] sm:$0xff]  ;;  %801 = vmatprep.mubr.msk.f32.mxu1 %vm1045_vm0, %v1044_v0 }
  0x28   :  { %651 = vmatprep.subr.mxu0 %v92_v3  ;;  %v74_v8 = vld [vmem:[#allocation5 + $0x60] sm:$0xff]  ;;  %v73_v10 = vld [vmem:[#allocation5 + $0x58] sm:$0xff]  ;;  %v88_v11 = vld [vmem:[#allocation5 + $0xd0] sm:$0xff] }
  0x29   :  { %652 = vmatpush3.msra.mxu0 %v76_v4  ;;  %v72_v12 = vld [vmem:[#allocation5 + $0x50] sm:$0xff]  ;;  %v87_v13 = vld [vmem:[#allocation5 + $0xc8] sm:$0xff]  ;;  %v61_v14 = vld [vmem:[#allocation2 + $0x8] sm:$0xff] }
  0x2a   :  { %653 = vmatprep.subr.mxu0 %v91_v5  ;;  %v71_v15 = vld [vmem:[#allocation5 + $0x48] sm:$0xff]  ;;  %165 = vmatprep.mubr.f32.mxu0 %v61_v14  ;;  %v1094_v16 = vld [vmem:[#allocation7 + $0x78] sm:$0xff]  ;;  %v1096_v17 = vld [vmem:[#allocation7 + $0x70] sm:$0xff] }
  0x2b   :  { %654 = vmatpush3.msra.mxu0 %v75_v6  ;;  %v86_v18 = vld [vmem:[#allocation5 + $0xc0] sm:$0xff]  ;;  %770 = vmatpush3.msra.mxu1 %v1094_v16  ;;  %v1100_v20 = vld [vmem:[#allocation7 + $0x68] sm:$0xff]  ;;  %v85_v21 = vld [vmem:[#allocation5 + $0xb8] sm:$0xff] }
  0x2c   :  { %655 = vmatprep.subr.mxu0 %v90_v7  ;;  %v70_v19 = vld [vmem:[#allocation5 + $0x40] sm:$0xff]  ;;  %771 = vmatprep.subr.mxu1 %v1044_v0  ;;  %v69_v22 = vld [vmem:[#allocation5 + $0x38] sm:$0xff]  ;;  %v84_v24 = vld [vmem:[#allocation5 + $0xb0] sm:$0xff] }
  0x2d   :  { %656 = vmatpush3.msra.mxu0 %v74_v8  ;;  %772 = vmatpush3.msra.mxu1 %v1096_v17  ;;  %v1104_v23 = vld [vmem:[#allocation7 + $0x60] sm:$0xff]  ;;  %v68_v25 = vld [vmem:[#allocation5 + $0x30] sm:$0xff]  ;;  %v1108_v26 = vld [vmem:[#allocation7 + $0x58] sm:$0xff] }
  0x2e   :  { %657 = vmatprep.subr.mxu0 %v89_v9  ;;  %773 = vmatprep.subr.mxu1 %v1044_v0  ;;  %v83_v27 = vld [vmem:[#allocation5 + $0xa8] sm:$0xff]  ;;  %v1112_v29 = vld [vmem:[#allocation7 + $0x50] sm:$0xff]  ;;  %v82_v30 = vld [vmem:[#allocation5 + $0xa0] sm:$0xff] }
  0x2f   :  { %658 = vmatpush3.msra.mxu0 %v73_v10  ;;  %774 = vmatpush3.msra.mxu1 %v1100_v20  ;;  %v67_v28 = vld [vmem:[#allocation5 + $0x28] sm:$0xff]  ;;  %v66_v31 = vld [vmem:[#allocation5 + $0x20] sm:$0xff]  ;;  %v81_v33 = vld [vmem:[#allocation5 + $0x98] sm:$0xff] }
  0x30   :  { %659 = vmatprep.subr.mxu0 %v88_v11  ;;  %775 = vmatprep.subr.mxu1 %v1044_v0  ;;  %v1116_v32 = vld [vmem:[#allocation7 + $0x48] sm:$0xff]  ;;  %v65_v34 = vld [vmem:[#allocation5 + $0x18] sm:$0xff]  ;;  %v1120_v35 = vld [vmem:[#allocation7 + $0x40] sm:$0xff] }
  0x31   :  { %660 = vmatpush3.msra.mxu0 %v72_v12  ;;  %776 = vmatpush3.msra.mxu1 %v1104_v23  ;;  %v80_v36 = vld [vmem:[#allocation5 + $0x90] sm:$0xff]  ;;  %v1124_v38 = vld [vmem:[#allocation7 + $0x38] sm:$0xff]  ;;  %v79_v39 = vld [vmem:[#allocation5 + $0x88] sm:$0xff] }
  0x32   :  { %661 = vmatprep.subr.mxu0 %v87_v13  ;;  %777 = vmatprep.subr.mxu1 %v1044_v0  ;;  %v64_v37 = vld [vmem:[#allocation5 + $0x10] sm:$0xff]  ;;  %v63_v40 = vld [vmem:[#allocation5 + $0x8] sm:$0xff]  ;;  %v78_v42 = vld [vmem:[#allocation5 + $0x80] sm:$0xff] }
  0x33   :  { %662 = vmatpush3.msra.mxu0 %v71_v15  ;;  %778 = vmatpush3.msra.mxu1 %v1108_v26  ;;  %v1128_v41 = vld [vmem:[#allocation7 + $0x30] sm:$0xff]  ;;  %v62_v43 = vld [vmem:[#allocation5] sm:$0xff]  ;;  %v1132_v44 = vld [vmem:[#allocation7 + $0x28] sm:$0xff] }
  0x34   :  { %663 = vmatprep.subr.mxu0 %v86_v18  ;;  %779 = vmatprep.subr.mxu1 %v1044_v0  ;;  %v60_v45 = vld [vmem:[#allocation2] sm:$0xff]  ;;  %v1137_v46 = vld [vmem:[#allocation7 + $0x20] sm:$0xff]  ;;  %v1167_v47 = vld [vmem:[#allocation7 + $0x18] sm:$0xff] }
  0x35   :  { %664 = vmatpush3.msra.mxu0 %v70_v19  ;;  %780 = vmatpush3.msra.mxu1 %v1112_v29  ;;  %v1172_v48 = vld [vmem:[#allocation7 + $0x10] sm:$0xff]  ;;  %v1178_v49 = vld [vmem:[#allocation7 + $0x8] sm:$0xff]  ;;  %v1184_v50 = vld [vmem:[#allocation7] sm:$0xff] }
  0x36   :  { %665 = vmatprep.subr.mxu0 %v85_v21  ;;  %781 = vmatprep.subr.mxu1 %v1044_v0  ;;  %v632_v52 = vld [vmem:[%s1335_s2] ss:$0 sm:$0xff] }
  0x37   :  { %666 = vmatpush3.msra.mxu0 %v69_v22  ;;  %782 = vmatpush3.msra.mxu1 %v1116_v32  ;;  %v634_v10 = vld [vmem:[%s1337_s4] ss:$0 sm:$0xff]  ;;  %s1047_s4 = smov [#allocation8]  }
  0x38   :  { %667 = vmatprep.subr.mxu0 %v84_v24  ;;  %783 = vmatprep.subr.mxu1 %v1044_v0  ;;  %s619_s10 = sshll.u32 %s1047_s4, 4  ;;  %s620_s10 = int_to_ptr.vmem [resolvable:$true] %s619_s10 }
  0x39   :  { %668 = vmatpush3.msra.mxu0 %v68_v25  ;;  %784 = vmatpush3.msra.mxu1 %v1120_v35  ;;  %s1013_s11 = scalar_lea.vmem %s620_s10, 640  ;;  %p1018_p2 = scmp.lt.s32.totalorder %s620_s10, %s620_s10 }
  0x3a   :  { %669 = vmatprep.subr.mxu0 %v83_v27  ;;  %785 = vmatprep.subr.mxu1 %v1044_v0  ;;  %p1014_p1 = scmp.ne.s32.totalorder %s620_s10, %s1013_s11  ;;  %p1019_p3 = scmp.lt.s32.totalorder %s1013_s11, %s1013_s11 }
  0x3b   :  { %670 = vmatpush3.msra.mxu0 %v67_v28  ;;  %786 = vmatpush3.msra.mxu1 %v1124_v38 }
  0x3c   :  { %671 = vmatprep.subr.mxu0 %v82_v30  ;;  %787 = vmatprep.subr.mxu1 %v1044_v0  ;;  %p1020_p4 = por %p1019_p3, %p1018_p2 }
  0x3d   :  { %672 = vmatpush3.msra.mxu0 %v66_v31  ;;  %788 = vmatpush3.msra.mxu1 %v1128_v41 }
  0x3e   :  { %673 = vmatprep.subr.mxu0 %v81_v33  ;;  %789 = vmatprep.subr.mxu1 %v1044_v0  ;;  %p1021_p5 = pnand %p1020_p4, %p1014_p1 }
  0x3f   :  { %674 = vmatpush3.msra.mxu0 %v65_v34  ;;  %790 = vmatpush3.msra.mxu1 %v1132_v44 }
  0x40   :  { %675 = vmatprep.subr.mxu0 %v80_v36  ;;  %791 = vmatprep.subr.mxu1 %v1044_v0 }
  0x41   :  { %676 = vmatpush3.msra.mxu0 %v64_v37  ;;  %792 = vmatpush3.msra.mxu1 %v1137_v46 }
  0x42   :  { %677 = vmatprep.subr.mxu0 %v79_v39  ;;  %793 = vmatprep.subr.mxu1 %v1044_v0 }
  0x43   :  { %678 = vmatpush3.msra.mxu0 %v63_v40  ;;  %794 = vmatpush3.msra.mxu1 %v1167_v47 }
  0x44   :  { %679 = vmatprep.subr.mxu0 %v78_v42  ;;  %795 = vmatprep.subr.mxu1 %v1044_v0 }
  0x45   :  { %680 = vmatpush3.msra.mxu0 %v62_v43  ;;  %796 = vmatpush3.msra.mxu1 %v1172_v48 }
  0x46   :  { %166 = vmatmul.mubr.f32.vlgmr.msra.gmra.mxu0 %v60_v45  ;;  %804 = vmatprep.subr.mxu0 %v1044_v0 }
  0x47   :  { %805 = vmatpush3.msra.mxu0 %v1094_v16  ;;  %797 = vmatprep.subr.mxu1 %v1044_v0 }
  0x48   :  { %806 = vmatprep.subr.mxu0 %v1044_v0  ;;  %798 = vmatpush3.msra.mxu1 %v1178_v49 }
  0x49   :  { %807 = vmatpush3.msra.mxu0 %v1096_v17  ;;  %799 = vmatprep.subr.mxu1 %v1044_v0 }
  0x4a   :  { %808 = vmatprep.subr.mxu0 %v1044_v0  ;;  %800 = vmatpush3.msra.mxu1 %v1184_v50 }
  0x4b   :  { %809 = vmatpush3.msra.mxu0 %v1100_v20  ;;  %839 = vmatprep.subr.mxu1 %v1044_v0 }
  0x4c   :  { %810 = vmatprep.subr.mxu0 %v1044_v0  ;;  %836 = vmatprep.mubr.msk.f32.mxu0 %vm1045_vm0, %v1044_v0 }
  0x4d   :  { %811 = vmatpush3.msra.mxu0 %v1104_v23 }
  0x4e   :  { %812 = vmatprep.subr.mxu0 %v1044_v0 }
  0x4f   :  { %813 = vmatpush3.msra.mxu0 %v1108_v26 }
  0x50   :  { %814 = vmatprep.subr.mxu0 %v1044_v0 }
  0x51   :  { %815 = vmatpush3.msra.mxu0 %v1112_v29 }
  0x52   :  { %816 = vmatprep.subr.mxu0 %v1044_v0 }
  0x53   :  { %817 = vmatpush3.msra.mxu0 %v1116_v32 }
  0x54   :  { %818 = vmatprep.subr.mxu0 %v1044_v0 }
  0x55   :  { %819 = vmatpush3.msra.mxu0 %v1120_v35 }
  0x56   :  { %820 = vmatprep.subr.mxu0 %v1044_v0 }
  0x57   :  { %821 = vmatpush3.msra.mxu0 %v1124_v38 }
  0x58   :  { %822 = vmatprep.subr.mxu0 %v1044_v0 }
  0x59   :  { %823 = vmatpush3.msra.mxu0 %v1128_v41 }
  0x5a   :  { %824 = vmatprep.subr.mxu0 %v1044_v0 }
  0x5b   :  { %825 = vmatpush3.msra.mxu0 %v1132_v44 }
  0x5c   :  { %826 = vmatprep.subr.mxu0 %v1044_v0 }
  0x5d   :  { %827 = vmatpush3.msra.mxu0 %v1137_v46 }
  0x5e   :  { %828 = vmatprep.subr.mxu0 %v1044_v0 }
  0x5f   :  { %829 = vmatpush3.msra.mxu0 %v1167_v47 }
  0x60   :  { %830 = vmatprep.subr.mxu0 %v1044_v0 }
  0x61   :  { %831 = vmatpush3.msra.mxu0 %v1172_v48 }
  0x62   :  { %832 = vmatprep.subr.mxu0 %v1044_v0 }
  0x63   :  { %833 = vmatpush3.msra.mxu0 %v1178_v49 }
  0x64   :  { %834 = vmatprep.subr.mxu0 %v1044_v0 }
  0x65   :  { %835 = vmatpush3.msra.mxu0 %v1184_v50 }
  0x66   :  { %874 = vmatprep.subr.mxu0 %v1044_v0 }
 0x106   :  { %v681_v51 = vpop.f32.mrf.mxu0 }
 0x108   :  { %v682_v53 = vpop.f32.mrf.mxu0 }
 0x109   :  { %v683_v54 = vadd.f32 %v682_v53, %v681_v51 }
 0x10b   :  { %v1198_v55 = vadd.f32 %v683_v54, %v632_v52 }
 0x10d   :  { %vm193_vm1 = vcmp.gt.f32.partialorder %v1198_v55, 1.0  ;;  %v278_v56 = vmul.f32 0.9, %v1198_v55 }
 0x10e   :  { %802 = vmatmul.mubr.msk.f32.vlgmr.msra.gmra.mxu1 %vm193_vm1, %v1046_v57  ;;  %v633_v59 = vsel %vm193_vm1, 1.0, %v1044_v0 }
 0x10f   :  { %v279_v58 = vadd.f32 %v278_v56, %v1198_v55  ;;  %840 = vmatpush3.msra.mxu1 %v1094_v16  ;;  %871 = vmatprep.mubr.msk.f32.mxu1 %vm1045_vm0, %v1044_v0 }
 0x110   :  { %841 = vmatprep.subr.mxu1 %v1044_v0 }
 0x111   :  { %v280_v60 = vsub.f32 %v279_v58, %v633_v59  ;;  %842 = vmatpush3.msra.mxu1 %v1096_v17 }
 0x112   :  { %843 = vmatprep.subr.mxu1 %v1044_v0 }
 0x113   :  { %844 = vmatpush3.msra.mxu1 %v1100_v20  ;;  %vm281_vm2 = vcmp.gt.f32.partialorder %v280_v60, 1.0  ;;  %v362_v61 = vmul.f32 0.9, %v280_v60 }
 0x114   :  { %845 = vmatprep.subr.mxu1 %v1044_v0  ;;  %837 = vmatmul.mubr.msk.f32.vlgmr.msra.gmra.mxu0 %vm281_vm2, %v1046_v57  ;;  %v637_v63 = vsel %vm281_vm2, 1.0, %v1044_v0 }
 0x115   :  { %846 = vmatpush3.msra.mxu1 %v1104_v23  ;;  %875 = vmatpush3.msra.mxu0 %v1094_v16  ;;  %v363_v62 = vadd.f32 %v362_v61, %v1198_v55 }
 0x116   :  { %847 = vmatprep.subr.mxu1 %v1044_v0  ;;  %876 = vmatprep.subr.mxu0 %v1044_v0 }
 0x117   :  { %848 = vmatpush3.msra.mxu1 %v1108_v26  ;;  %877 = vmatpush3.msra.mxu0 %v1096_v17  ;;  %v364_v1 = vsub.f32 %v363_v62, %v637_v63 }
 0x118   :  { %849 = vmatprep.subr.mxu1 %v1044_v0  ;;  %878 = vmatprep.subr.mxu0 %v1044_v0 }
 0x119   :  { %850 = vmatpush3.msra.mxu1 %v1112_v29  ;;  %879 = vmatpush3.msra.mxu0 %v1100_v20  ;;  %v446_v2 = vmul.f32 0.9, %v364_v1  ;;  %vm365_vm3 = vcmp.gt.f32.partialorder %v364_v1, 1.0 }
 0x11a   :  { %851 = vmatprep.subr.mxu1 %v1044_v0  ;;  %880 = vmatprep.subr.mxu0 %v1044_v0  ;;  %v640_v4 = vsel %vm365_vm3, 1.0, %v1044_v0 }
 0x11b   :  { %852 = vmatpush3.msra.mxu1 %v1116_v32  ;;  %881 = vmatpush3.msra.mxu0 %v1104_v23  ;;  %v447_v3 = vadd.f32 %v446_v2, %v1198_v55 }
 0x11c   :  { %853 = vmatprep.subr.mxu1 %v1044_v0  ;;  %882 = vmatprep.subr.mxu0 %v1044_v0 }
 0x11d   :  { %854 = vmatpush3.msra.mxu1 %v1120_v35  ;;  %883 = vmatpush3.msra.mxu0 %v1108_v26  ;;  %v448_v5 = vsub.f32 %v447_v3, %v640_v4 }
 0x11e   :  { %855 = vmatprep.subr.mxu1 %v1044_v0  ;;  %884 = vmatprep.subr.mxu0 %v1044_v0 }
 0x11f   :  { %856 = vmatpush3.msra.mxu1 %v1124_v38  ;;  %885 = vmatpush3.msra.mxu0 %v1112_v29  ;;  %vm449_vm4 = vcmp.gt.f32.partialorder %v448_v5, 1.0  ;;  %v530_v6 = vmul.f32 0.9, %v448_v5 }
 0x120   :  { %857 = vmatprep.subr.mxu1 %v1044_v0  ;;  %886 = vmatprep.subr.mxu0 %v1044_v0  ;;  %v643_v8 = vsel %vm449_vm4, 1.0, %v1044_v0 }
 0x121   :  { %858 = vmatpush3.msra.mxu1 %v1128_v41  ;;  %887 = vmatpush3.msra.mxu0 %v1116_v32  ;;  %v531_v7 = vadd.f32 %v530_v6, %v1198_v55 }
 0x122   :  { %859 = vmatprep.subr.mxu1 %v1044_v0  ;;  %888 = vmatprep.subr.mxu0 %v1044_v0 }
 0x123   :  { %860 = vmatpush3.msra.mxu1 %v1132_v44  ;;  %889 = vmatpush3.msra.mxu0 %v1120_v35  ;;  %v532_v9 = vsub.f32 %v531_v7, %v643_v8 }
 0x124   :  { %861 = vmatprep.subr.mxu1 %v1044_v0  ;;  %890 = vmatprep.subr.mxu0 %v1044_v0 }
 0x125   :  { %862 = vmatpush3.msra.mxu1 %v1137_v46  ;;  %891 = vmatpush3.msra.mxu0 %v1124_v38  ;;  %vm533_vm5 = vcmp.gt.f32.partialorder %v532_v9, 1.0 }
 0x126   :  { %863 = vmatprep.subr.mxu1 %v1044_v0  ;;  %892 = vmatprep.subr.mxu0 %v1044_v0 }
 0x127   :  { %864 = vmatpush3.msra.mxu1 %v1167_v47  ;;  %893 = vmatpush3.msra.mxu0 %v1128_v41 }
 0x128   :  { %865 = vmatprep.subr.mxu1 %v1044_v0  ;;  %894 = vmatprep.subr.mxu0 %v1044_v0 }
 0x129   :  { %866 = vmatpush3.msra.mxu1 %v1172_v48  ;;  %895 = vmatpush3.msra.mxu0 %v1132_v44 }
 0x12a   :  { %867 = vmatprep.subr.mxu1 %v1044_v0  ;;  %896 = vmatprep.subr.mxu0 %v1044_v0 }
 0x12b   :  { %868 = vmatpush3.msra.mxu1 %v1178_v49  ;;  %897 = vmatpush3.msra.mxu0 %v1137_v46 }
 0x12c   :  { %869 = vmatprep.subr.mxu1 %v1044_v0  ;;  %898 = vmatprep.subr.mxu0 %v1044_v0 }
 0x12d   :  { %870 = vmatpush3.msra.mxu1 %v1184_v50  ;;  %899 = vmatpush3.msra.mxu0 %v1167_v47 }
 0x12e   :  { %872 = vmatmul.mubr.msk.f32.vlgmr.msra.gmra.mxu1 %vm365_vm3, %v1046_v57  ;;  %900 = vmatprep.subr.mxu0 %v1044_v0 }
 0x12f   :  { %909 = vmatprep.subr.mxu1 %v1044_v0  ;;  %901 = vmatpush3.msra.mxu0 %v1172_v48 }
 0x130   :  { %910 = vmatpush3.msra.mxu1 %v1094_v16  ;;  %902 = vmatprep.subr.mxu0 %v1044_v0 }
 0x131   :  { %911 = vmatprep.subr.mxu1 %v1044_v0  ;;  %903 = vmatpush3.msra.mxu0 %v1178_v49 }
 0x132   :  { %912 = vmatpush3.msra.mxu1 %v1096_v17  ;;  %904 = vmatprep.subr.mxu0 %v1044_v0 }
 0x133   :  { %913 = vmatprep.subr.mxu1 %v1044_v0  ;;  %905 = vmatpush3.msra.mxu0 %v1184_v50 }
 0x134   :  { %906 = vmatprep.mubr.msk.f32.mxu0 %vm1045_vm0, %v1044_v0  ;;  %914 = vmatpush3.msra.mxu1 %v1100_v20 }
 0x135   :  { %907 = vmatmul.mubr.msk.f32.vlgmr.msra.gmra.mxu0 %vm449_vm4, %v1046_v57  ;;  %915 = vmatprep.subr.mxu1 %v1044_v0 }
 0x136   :  { %916 = vmatpush3.msra.mxu1 %v1104_v23  ;;  %941 = vmatprep.mubr.msk.f32.mxu1 %vm1045_vm0, %v1044_v0 }
 0x137   :  { %917 = vmatprep.subr.mxu1 %v1044_v0 }
 0x138   :  { %918 = vmatpush3.msra.mxu1 %v1108_v26 }
 0x139   :  { %919 = vmatprep.subr.mxu1 %v1044_v0 }
 0x13a   :  { %920 = vmatpush3.msra.mxu1 %v1112_v29 }
 0x13b   :  { %921 = vmatprep.subr.mxu1 %v1044_v0 }
 0x13c   :  { %922 = vmatpush3.msra.mxu1 %v1116_v32 }
 0x13d   :  { %923 = vmatprep.subr.mxu1 %v1044_v0 }
 0x13e   :  { %924 = vmatpush3.msra.mxu1 %v1120_v35 }
 0x13f   :  { %925 = vmatprep.subr.mxu1 %v1044_v0 }
 0x140   :  { %926 = vmatpush3.msra.mxu1 %v1124_v38 }
 0x141   :  { %927 = vmatprep.subr.mxu1 %v1044_v0 }
 0x142   :  { %928 = vmatpush3.msra.mxu1 %v1128_v41 }
 0x143   :  { %929 = vmatprep.subr.mxu1 %v1044_v0 }
 0x144   :  { %930 = vmatpush3.msra.mxu1 %v1132_v44 }
 0x145   :  { %931 = vmatprep.subr.mxu1 %v1044_v0 }
 0x146   :  { %932 = vmatpush3.msra.mxu1 %v1137_v46 }
 0x147   :  { %933 = vmatprep.subr.mxu1 %v1044_v0 }
 0x148   :  { %934 = vmatpush3.msra.mxu1 %v1167_v47 }
 0x149   :  { %935 = vmatprep.subr.mxu1 %v1044_v0 }
 0x14a   :  { %936 = vmatpush3.msra.mxu1 %v1172_v48 }
 0x14b   :  { %937 = vmatprep.subr.mxu1 %v1044_v0 }
 0x14c   :  { %938 = vmatpush3.msra.mxu1 %v1178_v49 }
 0x14d   :  { %939 = vmatprep.subr.mxu1 %v1044_v0 }
 0x14e   :  { %940 = vmatpush3.msra.mxu1 %v1184_v50 }
 0x14f   :  { %942 = vmatmul.mubr.msk.f32.vlgmr.msra.gmra.mxu1 %vm533_vm5, %v1046_v57 }
 0x1ce   :  { %v268_v11 = vpop.f32.mrf.mxu1 }
 0x1cf   :  { %v269_v12 = vadd.f32 %v634_v10, %v268_v11 }
 0x1d0   :  { %v803_v13 = vpop.f32.mrf.mxu1 }
 0x1d1   :  { %vm274_vm6 = vcmp.gt.f32.partialorder %v269_v12, 1.0  ;;  %v354_v16 = vmul.f32 0.9, %v269_v12 }
 0x1d2   :  { %v636_v14 = vsel %vm274_vm6, 1.0, %v1044_v0 }
 0x1d3   :  { %277 = vst [vmem:[#allocation8] sm:$0xff] %v636_v14 }
 0x1d4   :  { %v350_v15 = vpop.f32.mrf.mxu0 }
 0x1d5   :  { %v351_v17 = vadd.f32 %v634_v10, %v350_v15 }
 0x1d6   :  { %v838_v18 = vpop.f32.mrf.mxu0 }
 0x1d7   :  { %v355_v19 = vadd.f32 %v354_v16, %v351_v17 }
 0x1d9   :  { %v356_v20 = vsub.f32 %v355_v19, %v636_v14 }
 0x1db   :  { %vm357_vm7 = vcmp.gt.f32.partialorder %v356_v20, 1.0  ;;  %v438_v24 = vmul.f32 0.9, %v356_v20 }
 0x1dc   :  { %v639_v21 = vsel %vm357_vm7, 1.0, %v1044_v0 }
 0x1dd   :  { %361 = vst [vmem:[#allocation8 + $0x8] sm:$0xff] %v639_v21 }
 0x1ee   :  { %v434_v22 = vpop.f32.mrf.mxu1 }
 0x1ef   :  { %v435_v23 = vadd.f32 %v634_v10, %v434_v22 }
 0x1f0   :  { %v873_v25 = vpop.f32.mrf.mxu1 }
 0x1f1   :  { %v439_v26 = vadd.f32 %v438_v24, %v435_v23 }
 0x1f3   :  { %v440_v27 = vsub.f32 %v439_v26, %v639_v21 }
 0x1f5   :  { %vm441_vm8 = vcmp.gt.f32.partialorder %v440_v27, 1.0  ;;  %v518_v28 = vpop.f32.mrf.mxu0  ;;  %v522_v29 = vmul.f32 0.9, %v440_v27 }
 0x1f6   :  { %v642_v30 = vsel %vm441_vm8, 1.0, %v1044_v0  ;;  %v519_v31 = vadd.f32 %v634_v10, %v518_v28 }
 0x1f7   :  { %445 = vst [vmem:[#allocation8 + $0x10] sm:$0xff] %v642_v30  ;;  %v908_v32 = vpop.f32.mrf.mxu0 }
 0x1f8   :  { %v523_v33 = vadd.f32 %v522_v29, %v519_v31 }
 0x1fa   :  { %v524_v34 = vsub.f32 %v523_v33, %v642_v30 }
 0x1fc   :  { %vm525_vm9 = vcmp.gt.f32.partialorder %v524_v34, 1.0  ;;  %v606_v38 = vmul.f32 0.9, %v524_v34 }
 0x1fd   :  { %v645_v35 = vsel %vm525_vm9, 1.0, %v1044_v0 }
 0x1fe   :  { %529 = vst [vmem:[#allocation8 + $0x18] sm:$0xff] %v645_v35 }
 0x20f   :  { %v602_v36 = vpop.f32.mrf.mxu1 }
 0x210   :  { %v603_v37 = vadd.f32 %v634_v10, %v602_v36 }
 0x211   :  { %v943_v39 = vpop.f32.mrf.mxu1 }
 0x212   :  { %v607_v40 = vadd.f32 %v606_v38, %v603_v37 }
 0x214   :  { %v608_v41 = vsub.f32 %v607_v40, %v645_v35 }
 0x216   :  { %vm609_vm10 = vcmp.gt.f32.partialorder %v608_v41, 1.0 }
 0x217   :  { %v648_v42 = vsel %vm609_vm10, 1.0, %v1044_v0 }
 0x218   :  { %613 = vst [vmem:[#allocation8 + $0x20] sm:$0xff] %v648_v42 }
 0x219   :  { %1024 = shalt.err (!%p1021_p5)
}
 0x21a   :  { %625 = dma.vmem_to_hbm [thread:$0]  %s620_s10, 640, %s1338_s5, [#allocation4], %s1040_s21, %s1040_s21, %s1041_s22  }
 0x21b   :  { %1037 = dma.done.wait [#allocation4], 640  }
 0x21c   :  { %1038 = vsyncadd [#allocation4], 4294966656 }
 0x21d   :  { %629 = vsyncpa [#allocation3], 1 }
 0x21e   :  { %630 = vsyncpa [#allocation6], 1 }
 0x21f   :  { %631 = vsyncpa [#allocation4], 1 }

</bundles_post_ra>
